<compile_context>
chip_gen: v5e
topology: v5e:2x2
jax: 0.10.0
libtpu: 0.0.40
codegen_flags: <defaults>
</compile_context>

<pallas_src>
import functools
import math

import jax
import jax.numpy as jnp
from jax.experimental import pallas as pl
from jax.experimental.pallas import tpu as pltpu

LOG_SIG_MAX = 2.0
LOG_SIG_MIN = -20.0
TANH_EPS = 1e-6
_LOG_2PI = math.log(2.0 * math.pi)


def _softplus(x):
    # matches F.softplus(beta=1, threshold=20)
    return jnp.where(x > 20.0, x, jnp.log1p(jnp.exp(jnp.minimum(x, 20.0))))


# ----------------------------------------------------------------------------
# Fused kernel: encoder -> shift -> policy -> rew, one grid step per task t.
# ----------------------------------------------------------------------------
def _fused_kernel(latent_dim, action_dim, out_width,
                  obs_ref, ctx_ref, eps_ref,
                  ew1, eb1, ew2, eb2, ew3, eb3,
                  pw1o, pw1z, pb1, pw2, pb2, pwh, pbh,
                  out_ref):
    L = latent_dim
    A = action_dim
    f32 = jnp.float32

    obs = obs_ref[0]          # (b, obs_dim)
    ctx = ctx_ref[0]          # (b, ctx_dim)
    eps = eps_ref[0]          # (b, A)
    b = obs.shape[0]

    # ---- context encoder MLP (per timestep row) -> (b, 2L) ----
    h = jnp.maximum(jnp.dot(ctx, ew1[...], preferred_element_type=f32) + eb1[...], 0.0)
    h = jnp.maximum(jnp.dot(h, ew2[...], preferred_element_type=f32) + eb2[...], 0.0)
    enc = jnp.dot(h, ew3[...], preferred_element_type=f32) + eb3[...]

    # softplus only on the variance half via a lane mask; keeps
    # [z_mean_next | z_var_next] packed in one (b, 2L) slab.
    lane = jax.lax.broadcasted_iota(jnp.int32, enc.shape, 1)
    enc_proc = jnp.where(lane >= L, _softplus(enc), enc)          # (b, 2L)

    # Prior-prepend + shift-by-one along the timestep (sublane) axis, entirely
    # in VMEM.  Implemented as an exact sub-diagonal shift matmul (0/1 matrix,
    # bit-exact on the MXU) + row-0 override with the ones prior; avoids any
    # sublane-unaligned concatenation.
    r = jax.lax.broadcasted_iota(jnp.int32, (b, b), 0)
    c = jax.lax.broadcasted_iota(jnp.int32, (b, b), 1)
    shift_mat = (r == c + 1).astype(f32)                          # (b, b)
    shifted = jnp.dot(shift_mat, enc_proc, preferred_element_type=f32)
    row = jax.lax.broadcasted_iota(jnp.int32, enc_proc.shape, 0)
    z_shift = jnp.where(row == 0, 1.0, shifted)                   # [z_mean | z_var]

    # rew = mean(log z_var, -1) - mean(log z_var_next, -1); z_var row 0 == ones.
    mlog_var = jnp.mean(jnp.log(z_shift[:, L:]), axis=1, keepdims=True)
    mlog_next = jnp.mean(jnp.log(enc_proc[:, L:]), axis=1, keepdims=True)
    rew = mlog_var - mlog_next                                    # (b, 1)

    # ---- TanhGaussian policy: trunk + fused mean|log_std head ----
    # policy input concat [obs, z_mean, z_var] folded into a split first matmul:
    #   pin @ W1 == obs @ W1[:obs_dim] + z_shift @ W1[obs_dim:]
    g = jnp.maximum(jnp.dot(obs, pw1o[...], preferred_element_type=f32)
                    + jnp.dot(z_shift, pw1z[...], preferred_element_type=f32)
                    + pb1[...], 0.0)
    g = jnp.maximum(jnp.dot(g, pw2[...], preferred_element_type=f32) + pb2[...], 0.0)
    heads = jnp.dot(g, pwh[...], preferred_element_type=f32) + pbh[...]   # (b, 2A)
    mean = heads[:, :A]
    log_std = jnp.clip(heads[:, A:], LOG_SIG_MIN, LOG_SIG_MAX)
    std = jnp.exp(log_std)
    pre_tanh = mean + std * eps                                    # rsample()
    action = jnp.tanh(pre_tanh)
    # (pre_tanh - mean) / std == eps exactly -> no vector divide needed.
    normal_logp = -0.5 * jnp.square(eps) - log_std - 0.5 * _LOG_2PI
    logp = jnp.sum(normal_logp - jnp.log(1.0 - jnp.square(action) + TANH_EPS),
                   axis=1, keepdims=True)                          # (b, 1)

    # ---- write the single lane-dense packed output slab -------------------
    # The HBM writeback is one dense (b, out_width) DMA per grid step; the few
    # masked vst's below only touch the VMEM output buffer (negligible here).
    col = 0

    def put(piece):
        nonlocal col
        w = piece.shape[1]
        out_ref[0, :, col:col + w] = piece
        col += w

    put(action)       # A
    put(mean)         # A
    put(log_std)      # A
    put(std)          # A
    put(pre_tanh)     # A
    put(z_shift)      # 2L  -> [z_mean | z_var]
    put(enc_proc)     # 2L  -> [z_mean_next | z_var_next]
    put(logp)         # 1
    put(rew)          # 1
    if out_width > col:
        out_ref[0, :, col:out_width] = jnp.zeros((b, out_width - col), f32)


def exp_agent_forward_packed(obs, context, eps, enc_params, pol_params, latent_dim):
    """Single pallas_call over the task axis; returns the packed (t, b, OUT_W) slab."""
    t, b, obs_dim = obs.shape
    A = eps.shape[-1]
    L = latent_dim
    used = 5 * A + 4 * L + 2
    out_w = ((used + 127) // 128) * 128          # lane-dense output width

    ew1, eb1, ew2, eb2, ew3, eb3 = enc_params
    pw1, pb1, pw2, pb2, pwh, pbh = pol_params
    pw1o, pw1z = pw1[:obs_dim, :], pw1[obs_dim:, :]   # split so the kernel needs no input concat
    weights = (ew1, eb1, ew2, eb2, ew3, eb3, pw1o, pw1z, pb1, pw2, pb2, pwh, pbh)

    def row_spec(x):
        return pl.BlockSpec((1,) + tuple(x.shape[1:]), lambda i: (i, 0, 0))

    def weight_spec(w):
        # constant index_map -> weight tile stays resident across grid steps
        return pl.BlockSpec(tuple(w.shape), lambda i: (0, 0))

    kernel = functools.partial(_fused_kernel, L, A, out_w)
    return pl.pallas_call(
        kernel,
        out_shape=jax.ShapeDtypeStruct((t, b, out_w), jnp.float32),
        grid_spec=pltpu.PrefetchScalarGridSpec(
            num_scalar_prefetch=0,
            grid=(t,),
            in_specs=[row_spec(obs), row_spec(context), row_spec(eps)]
                     + [weight_spec(w) for w in weights],
            out_specs=pl.BlockSpec((1, b, out_w), lambda i: (i, 0, 0)),
        ),
        compiler_params=pltpu.CompilerParams(
            dimension_semantics=("parallel",)),
    )(obs, context, eps, *weights)


# ----------------------------------------------------------------------------
# ExpAgent wrapper
# ----------------------------------------------------------------------------
class ExpAgentPallas:
    def __init__(self, latent_dim, obs_dim, action_dim, context_dim,
                 hidden=32, key=None):
        if key is None:
            key = jax.random.PRNGKey(0)
        self.latent_dim = latent_dim
        self.obs_dim = obs_dim
        self.action_dim = action_dim
        self.context_dim = context_dim
        ks = jax.random.split(key, 8)

        def lin(k, fan_in, fan_out):
            w = jax.random.normal(k, (fan_in, fan_out), jnp.float32) / jnp.sqrt(float(fan_in))
            return w, jnp.zeros((1, fan_out), jnp.float32)

        # context encoder: context_dim -> hidden -> hidden -> 2*latent_dim
        ew1, eb1 = lin(ks[0], context_dim, hidden)
        ew2, eb2 = lin(ks[1], hidden, hidden)
        ew3, eb3 = lin(ks[2], hidden, 2 * latent_dim)
        self.enc_params = (ew1, eb1, ew2, eb2, ew3, eb3)

        # policy: (obs_dim + 2*latent_dim) -> hidden -> hidden -> [mean | log_std]
        pin = obs_dim + 2 * latent_dim
        pw1, pb1 = lin(ks[3], pin, hidden)
        pw2, pb2 = lin(ks[4], hidden, hidden)
        wm, bm = lin(ks[5], hidden, action_dim)
        ws, bs = lin(ks[6], hidden, action_dim)
        # mean / log_std heads fused into one (hidden, 2A) matmul
        self.policy_params = (pw1, pb1, pw2, pb2,
                              jnp.concatenate([wm, ws], axis=1),
                              jnp.concatenate([bm, bs], axis=1))
        self.sample_key = ks[7]

    def forward(self, obs, context, key=None):
        if key is None:
            # fresh noise every call (rsample parity)
            self.sample_key, key = jax.random.split(self.sample_key)
        t, b, _ = obs.shape
        L, A = self.latent_dim, self.action_dim
        eps = jax.random.normal(key, (t, b, A), jnp.float32)
        # TODO(synk): eps could be drawn in-kernel (pltpu.prng_seed + stateful_normal)
        # to drop this tiny input DMA.

        packed = exp_agent_forward_packed(
            obs, context, eps, self.enc_params, self.policy_params, L)

        off = 0

        def take(width):
            nonlocal off
            piece = packed[:, :, off:off + width]
            off += width
            return piece

        action = take(A).reshape(t * b, A)
        mean = take(A).reshape(t * b, A)
        log_std = take(A).reshape(t * b, A)
        std = take(A).reshape(t * b, A)
        pre_tanh = take(A).reshape(t * b, A)
        z_mean = take(L)
        z_var = take(L)
        z_mean_next = take(L)
        z_var_next = take(L)
        log_prob = take(1).reshape(t * b, 1)
        rew = jax.lax.stop_gradient(take(1).reshape(t, b))

        # (action, mean, log_std, log_prob, entropy, std, mean_action_log_prob, pre_tanh)
        policy_outputs = (action, mean, log_std, log_prob, None, std, None, pre_tanh)
        return policy_outputs, z_mean, z_var, z_mean_next, z_var_next, rew


# ----------------------------------------------------------------------------
# Pure-JAX reference (mirrors the PyTorch module) for a correctness check
# ----------------------------------------------------------------------------
def _reference_forward(obs, context, eps, enc_params, pol_params, latent_dim):
    t, b, _ = obs.shape
    L = latent_dim
    ew1, eb1, ew2, eb2, ew3, eb3 = enc_params
    pw1, pb1, pw2, pb2, pwh, pbh = pol_params
    x = context.reshape(t * b, -1)
    h = jnp.maximum(x @ ew1 + eb1, 0.0)
    h = jnp.maximum(h @ ew2 + eb2, 0.0)
    enc = (h @ ew3 + eb3).reshape(t, b, 2 * L)
    z_mean_next = enc[..., :L]
    z_var_next = jax.nn.softplus(enc[..., L:])
    ones = jnp.ones((t, 1, L), jnp.float32)
    z_mean = jnp.concatenate([ones, z_mean_next], axis=1)[:, :-1, :]
    z_var = jnp.concatenate([ones, z_var_next], axis=1)[:, :-1, :]
    pin = jnp.concatenate([obs, z_mean, z_var], axis=2).reshape(t * b, -1)
    g = jnp.maximum(pin @ pw1 + pb1, 0.0)
    g = jnp.maximum(g @ pw2 + pb2, 0.0)
    heads = g @ pwh + pbh
    A = heads.shape[-1] // 2
    mean = heads[:, :A]
    log_std = jnp.clip(heads[:, A:], LOG_SIG_MIN, LOG_SIG_MAX)
    std = jnp.exp(log_std)
    e = eps.reshape(t * b, A)
    pre_tanh = mean + std * e
    action = jnp.tanh(pre_tanh)
    normal_logp = -0.5 * jnp.square(e) - log_std - 0.5 * _LOG_2PI
    log_prob = jnp.sum(normal_logp - jnp.log(1.0 - jnp.square(action) + TANH_EPS),
                       axis=1, keepdims=True)
    rew = jnp.mean(jnp.log(z_var), axis=2) - jnp.mean(jnp.log(z_var_next), axis=2)
    return ((action, mean, log_std, log_prob, None, std, None, pre_tanh),
            z_mean, z_var, z_mean_next, z_var_next, rew)


if __name__ == "__main__":
    key = jax.random.PRNGKey(0)
    T, B = 4, 8                                   # tasks x timesteps
    obs_dim, action_dim, latent_dim = 16, 8, 8
    context_dim = obs_dim + action_dim + 1        # (o, a, r), use_next_obs_in_context=False

    k_obs, k_ctx, k_agent, k_eps = jax.random.split(key, 4)
    obs = jax.random.normal(k_obs, (T, B, obs_dim), jnp.float32)
    context = jax.random.normal(k_ctx, (T, B, context_dim), jnp.float32)

    agent = ExpAgentPallas(latent_dim, obs_dim, action_dim, context_dim,
                           hidden=32, key=k_agent)
    out = agent.forward(obs, context, key=k_eps)
    jax.block_until_ready(jax.tree_util.tree_leaves(out))

    policy_outputs, z_mean, z_var, z_mean_next, z_var_next, rew = out
    assert policy_outputs[0].shape == (T * B, action_dim)
    assert policy_outputs[3].shape == (T * B, 1)
    assert z_mean.shape == (T, B, latent_dim) and z_var.shape == (T, B, latent_dim)
    assert rew.shape == (T, B)

    # correctness check against a pure-JAX reference of the PyTorch module
    eps = jax.random.normal(k_eps, (T, B, action_dim), jnp.float32)
    ref = _reference_forward(obs, context, eps, agent.enc_params,
                             agent.policy_params, latent_dim)
    for got, want in zip(jax.tree_util.tree_leaves(out),
                         jax.tree_util.tree_leaves(ref)):
        assert got.shape == want.shape
        assert jnp.allclose(got, want, rtol=5e-3, atol=5e-3), \
            float(jnp.max(jnp.abs(got - want)))

    print("KERNEL_OK")
</pallas_src>

<mosaic_0001>
module attributes {stable_mosaic.version = 11 : i64} {
  func.func @_fused_kernel(%arg0: i32, %arg1: memref<1x8x16xf32, #tpu.memory_space<vmem>>, %arg2: memref<1x8x25xf32, #tpu.memory_space<vmem>>, %arg3: memref<1x8x8xf32, #tpu.memory_space<vmem>>, %arg4: memref<25x32xf32, #tpu.memory_space<vmem>>, %arg5: memref<1x32xf32, #tpu.memory_space<vmem>>, %arg6: memref<32x32xf32, #tpu.memory_space<vmem>>, %arg7: memref<1x32xf32, #tpu.memory_space<vmem>>, %arg8: memref<32x16xf32, #tpu.memory_space<vmem>>, %arg9: memref<1x16xf32, #tpu.memory_space<vmem>>, %arg10: memref<16x32xf32, #tpu.memory_space<vmem>>, %arg11: memref<16x32xf32, #tpu.memory_space<vmem>>, %arg12: memref<1x32xf32, #tpu.memory_space<vmem>>, %arg13: memref<32x32xf32, #tpu.memory_space<vmem>>, %arg14: memref<1x32xf32, #tpu.memory_space<vmem>>, %arg15: memref<32x16xf32, #tpu.memory_space<vmem>>, %arg16: memref<1x16xf32, #tpu.memory_space<vmem>>, %arg17: memref<1x8x128xf32, #tpu.memory_space<vmem>>) attributes {dimension_semantics = [#tpu.dimension_semantics<parallel>], iteration_bounds = array<i64: 4>, scalar_prefetch = 0 : i64, scratch_operands = 0 : i64, tpu.core_type = #tpu.core_type<tc>, window_params = [{transform_indices = @transform_0, window_bounds = array<i64: 1, 8, 16>}, {transform_indices = @transform_1, window_bounds = array<i64: 1, 8, 25>}, {transform_indices = @transform_2, window_bounds = array<i64: 1, 8, 8>}, {pipeline_mode = #tpu.pipeline_mode<synchronous>, transform_indices = @transform_3, window_bounds = array<i64: 25, 32>}, {pipeline_mode = #tpu.pipeline_mode<synchronous>, transform_indices = @transform_4, window_bounds = array<i64: 1, 32>}, {pipeline_mode = #tpu.pipeline_mode<synchronous>, transform_indices = @transform_5, window_bounds = array<i64: 32, 32>}, {pipeline_mode = #tpu.pipeline_mode<synchronous>, transform_indices = @transform_6, window_bounds = array<i64: 1, 32>}, {pipeline_mode = #tpu.pipeline_mode<synchronous>, transform_indices = @transform_7, window_bounds = array<i64: 32, 16>}, {pipeline_mode = #tpu.pipeline_mode<synchronous>, transform_indices = @transform_8, window_bounds = array<i64: 1, 16>}, {pipeline_mode = #tpu.pipeline_mode<synchronous>, transform_indices = @transform_9, window_bounds = array<i64: 16, 32>}, {pipeline_mode = #tpu.pipeline_mode<synchronous>, transform_indices = @transform_10, window_bounds = array<i64: 16, 32>}, {pipeline_mode = #tpu.pipeline_mode<synchronous>, transform_indices = @transform_11, window_bounds = array<i64: 1, 32>}, {pipeline_mode = #tpu.pipeline_mode<synchronous>, transform_indices = @transform_12, window_bounds = array<i64: 32, 32>}, {pipeline_mode = #tpu.pipeline_mode<synchronous>, transform_indices = @transform_13, window_bounds = array<i64: 1, 32>}, {pipeline_mode = #tpu.pipeline_mode<synchronous>, transform_indices = @transform_14, window_bounds = array<i64: 32, 16>}, {pipeline_mode = #tpu.pipeline_mode<synchronous>, transform_indices = @transform_15, window_bounds = array<i64: 1, 16>}, {transform_indices = @transform_16, window_bounds = array<i64: 1, 8, 128>}]} {
    %c0 = arith.constant 0 : index
    %c0_0 = arith.constant 0 : index
    %c0_1 = arith.constant 0 : index
    %0 = vector.load %arg1[%c0, %c0_0, %c0_1] : memref<1x8x16xf32, #tpu.memory_space<vmem>>, vector<1x8x16xf32>
    %1 = vector.shape_cast %0 : vector<1x8x16xf32> to vector<8x16xf32>
    %c0_2 = arith.constant 0 : index
    %c0_3 = arith.constant 0 : index
    %c0_4 = arith.constant 0 : index
    %2 = vector.load %arg2[%c0_2, %c0_3, %c0_4] : memref<1x8x25xf32, #tpu.memory_space<vmem>>, vector<1x8x25xf32>
    %3 = vector.shape_cast %2 : vector<1x8x25xf32> to vector<8x25xf32>
    %c0_5 = arith.constant 0 : index
    %c0_6 = arith.constant 0 : index
    %c0_7 = arith.constant 0 : index
    %4 = vector.load %arg3[%c0_5, %c0_6, %c0_7] : memref<1x8x8xf32, #tpu.memory_space<vmem>>, vector<1x8x8xf32>
    %5 = vector.shape_cast %4 : vector<1x8x8xf32> to vector<8x8xf32>
    %c0_8 = arith.constant 0 : index
    %c0_9 = arith.constant 0 : index
    %6 = vector.load %arg4[%c0_8, %c0_9] : memref<25x32xf32, #tpu.memory_space<vmem>>, vector<25x32xf32>
    %cst = arith.constant dense<0.000000e+00> : vector<8x32xf32>
    %7 = tpu.matmul %3, %6, %cst {dimension_numbers = #tpu.dot_dimension_numbers<[1], [0], [0], [1], [0, 0, 1, 1], [], []>} : vector<8x25xf32>, vector<25x32xf32>, vector<8x32xf32> -> vector<8x32xf32>
    %c0_10 = arith.constant 0 : index
    %c0_11 = arith.constant 0 : index
    %8 = vector.load %arg5[%c0_10, %c0_11] : memref<1x32xf32, #tpu.memory_space<vmem>>, vector<1x32xf32>
    %9 = vector.broadcast %8 : vector<1x32xf32> to vector<8x32xf32>
    %10 = arith.addf %7, %9 : vector<8x32xf32>
    %cst_12 = arith.constant 0.000000e+00 : f32
    %11 = vector.broadcast %cst_12 : f32 to vector<8x32xf32>
    %12 = arith.maximumf %10, %11 : vector<8x32xf32>
    %c0_13 = arith.constant 0 : index
    %c0_14 = arith.constant 0 : index
    %13 = vector.load %arg6[%c0_13, %c0_14] : memref<32x32xf32, #tpu.memory_space<vmem>>, vector<32x32xf32>
    %cst_15 = arith.constant dense<0.000000e+00> : vector<8x32xf32>
    %14 = tpu.matmul %12, %13, %cst_15 {dimension_numbers = #tpu.dot_dimension_numbers<[1], [0], [0], [1], [0, 0, 1, 1], [], []>} : vector<8x32xf32>, vector<32x32xf32>, vector<8x32xf32> -> vector<8x32xf32>
    %c0_16 = arith.constant 0 : index
    %c0_17 = arith.constant 0 : index
    %15 = vector.load %arg7[%c0_16, %c0_17] : memref<1x32xf32, #tpu.memory_space<vmem>>, vector<1x32xf32>
    %16 = vector.broadcast %15 : vector<1x32xf32> to vector<8x32xf32>
    %17 = arith.addf %14, %16 : vector<8x32xf32>
    %cst_18 = arith.constant 0.000000e+00 : f32
    %18 = vector.broadcast %cst_18 : f32 to vector<8x32xf32>
    %19 = arith.maximumf %17, %18 : vector<8x32xf32>
    %c0_19 = arith.constant 0 : index
    %c0_20 = arith.constant 0 : index
    %20 = vector.load %arg8[%c0_19, %c0_20] : memref<32x16xf32, #tpu.memory_space<vmem>>, vector<32x16xf32>
    %cst_21 = arith.constant dense<0.000000e+00> : vector<8x16xf32>
    %21 = tpu.matmul %19, %20, %cst_21 {dimension_numbers = #tpu.dot_dimension_numbers<[1], [0], [0], [1], [0, 0, 1, 1], [], []>} : vector<8x32xf32>, vector<32x16xf32>, vector<8x16xf32> -> vector<8x16xf32>
    %c0_22 = arith.constant 0 : index
    %c0_23 = arith.constant 0 : index
    %22 = vector.load %arg9[%c0_22, %c0_23] : memref<1x16xf32, #tpu.memory_space<vmem>>, vector<1x16xf32>
    %23 = vector.broadcast %22 : vector<1x16xf32> to vector<8x16xf32>
    %24 = arith.addf %21, %23 : vector<8x16xf32>
    %25 = tpu.iota {dimensions = array<i32: 1>} : vector<8x16xi32>
    %c8_i32 = arith.constant 8 : i32
    %26 = vector.broadcast %c8_i32 : i32 to vector<8x16xi32>
    %27 = arith.cmpi sge, %25, %26 : vector<8x16xi32>
    %cst_24 = arith.constant 2.000000e+01 : f32
    %28 = vector.broadcast %cst_24 : f32 to vector<8x16xf32>
    %29 = arith.cmpf ogt, %24, %28 : vector<8x16xf32>
    %cst_25 = arith.constant 2.000000e+01 : f32
    %30 = vector.broadcast %cst_25 : f32 to vector<8x16xf32>
    %31 = arith.minimumf %24, %30 : vector<8x16xf32>
    %32 = math.exp %31 : vector<8x16xf32>
    %33 = math.log1p %32 : vector<8x16xf32>
    %34 = arith.select %29, %24, %33 : vector<8x16xi1>, vector<8x16xf32>
    %35 = arith.select %27, %34, %24 : vector<8x16xi1>, vector<8x16xf32>
    %36 = tpu.iota {dimensions = array<i32: 0>} : vector<8x8xi32>
    %37 = tpu.iota {dimensions = array<i32: 1>} : vector<8x8xi32>
    %c1_i32 = arith.constant 1 : i32
    %38 = vector.broadcast %c1_i32 : i32 to vector<8x8xi32>
    %39 = arith.addi %37, %38 : vector<8x8xi32>
    %40 = arith.cmpi eq, %36, %39 : vector<8x8xi32>
    %41 = arith.extui %40 : vector<8x8xi1> to vector<8x8xi32>
    %42 = arith.sitofp %41 : vector<8x8xi32> to vector<8x8xf32>
    %cst_26 = arith.constant dense<0.000000e+00> : vector<8x16xf32>
    %43 = tpu.matmul %42, %35, %cst_26 {dimension_numbers = #tpu.dot_dimension_numbers<[1], [0], [0], [1], [0, 0, 1, 1], [], []>} : vector<8x8xf32>, vector<8x16xf32>, vector<8x16xf32> -> vector<8x16xf32>
    %44 = tpu.iota {dimensions = array<i32: 0>} : vector<8x16xi32>
    %c0_i32 = arith.constant 0 : i32
    %45 = vector.broadcast %c0_i32 : i32 to vector<8x16xi32>
    %46 = arith.cmpi eq, %44, %45 : vector<8x16xi32>
    %cst_27 = arith.constant 1.000000e+00 : f32
    %47 = vector.broadcast %cst_27 : f32 to vector<8x16xf32>
    %48 = arith.select %46, %47, %43 : vector<8x16xi1>, vector<8x16xf32>
    %49 = vector.extract_strided_slice %48 {offsets = [0, 8], sizes = [8, 8], strides = [1, 1]} : vector<8x16xf32> to vector<8x8xf32>
    %50 = math.log %49 : vector<8x8xf32>
    %cst_28 = arith.constant dense<0.000000e+00> : vector<8xf32>
    %51 = vector.multi_reduction <add>, %50, %cst_28 [1] : vector<8x8xf32> to vector<8xf32>
    %52 = vector.shape_cast %51 : vector<8xf32> to vector<8x1xf32>
    %cst_29 = arith.constant 8.000000e+00 : f32
    %53 = vector.broadcast %cst_29 : f32 to vector<8x1xf32>
    %54 = arith.divf %52, %53 : vector<8x1xf32>
    %55 = vector.extract_strided_slice %35 {offsets = [0, 8], sizes = [8, 8], strides = [1, 1]} : vector<8x16xf32> to vector<8x8xf32>
    %56 = math.log %55 : vector<8x8xf32>
    %cst_30 = arith.constant dense<0.000000e+00> : vector<8xf32>
    %57 = vector.multi_reduction <add>, %56, %cst_30 [1] : vector<8x8xf32> to vector<8xf32>
    %58 = vector.shape_cast %57 : vector<8xf32> to vector<8x1xf32>
    %cst_31 = arith.constant 8.000000e+00 : f32
    %59 = vector.broadcast %cst_31 : f32 to vector<8x1xf32>
    %60 = arith.divf %58, %59 : vector<8x1xf32>
    %61 = arith.subf %54, %60 : vector<8x1xf32>
    %c0_32 = arith.constant 0 : index
    %c0_33 = arith.constant 0 : index
    %62 = vector.load %arg10[%c0_32, %c0_33] : memref<16x32xf32, #tpu.memory_space<vmem>>, vector<16x32xf32>
    %cst_34 = arith.constant dense<0.000000e+00> : vector<8x32xf32>
    %63 = tpu.matmul %1, %62, %cst_34 {dimension_numbers = #tpu.dot_dimension_numbers<[1], [0], [0], [1], [0, 0, 1, 1], [], []>} : vector<8x16xf32>, vector<16x32xf32>, vector<8x32xf32> -> vector<8x32xf32>
    %c0_35 = arith.constant 0 : index
    %c0_36 = arith.constant 0 : index
    %64 = vector.load %arg11[%c0_35, %c0_36] : memref<16x32xf32, #tpu.memory_space<vmem>>, vector<16x32xf32>
    %cst_37 = arith.constant dense<0.000000e+00> : vector<8x32xf32>
    %65 = tpu.matmul %48, %64, %cst_37 {dimension_numbers = #tpu.dot_dimension_numbers<[1], [0], [0], [1], [0, 0, 1, 1], [], []>} : vector<8x16xf32>, vector<16x32xf32>, vector<8x32xf32> -> vector<8x32xf32>
    %66 = arith.addf %63, %65 : vector<8x32xf32>
    %c0_38 = arith.constant 0 : index
    %c0_39 = arith.constant 0 : index
    %67 = vector.load %arg12[%c0_38, %c0_39] : memref<1x32xf32, #tpu.memory_space<vmem>>, vector<1x32xf32>
    %68 = vector.broadcast %67 : vector<1x32xf32> to vector<8x32xf32>
    %69 = arith.addf %66, %68 : vector<8x32xf32>
    %cst_40 = arith.constant 0.000000e+00 : f32
    %70 = vector.broadcast %cst_40 : f32 to vector<8x32xf32>
    %71 = arith.maximumf %69, %70 : vector<8x32xf32>
    %c0_41 = arith.constant 0 : index
    %c0_42 = arith.constant 0 : index
    %72 = vector.load %arg13[%c0_41, %c0_42] : memref<32x32xf32, #tpu.memory_space<vmem>>, vector<32x32xf32>
    %cst_43 = arith.constant dense<0.000000e+00> : vector<8x32xf32>
    %73 = tpu.matmul %71, %72, %cst_43 {dimension_numbers = #tpu.dot_dimension_numbers<[1], [0], [0], [1], [0, 0, 1, 1], [], []>} : vector<8x32xf32>, vector<32x32xf32>, vector<8x32xf32> -> vector<8x32xf32>
    %c0_44 = arith.constant 0 : index
    %c0_45 = arith.constant 0 : index
    %74 = vector.load %arg14[%c0_44, %c0_45] : memref<1x32xf32, #tpu.memory_space<vmem>>, vector<1x32xf32>
    %75 = vector.broadcast %74 : vector<1x32xf32> to vector<8x32xf32>
    %76 = arith.addf %73, %75 : vector<8x32xf32>
    %cst_46 = arith.constant 0.000000e+00 : f32
    %77 = vector.broadcast %cst_46 : f32 to vector<8x32xf32>
    %78 = arith.maximumf %76, %77 : vector<8x32xf32>
    %c0_47 = arith.constant 0 : index
    %c0_48 = arith.constant 0 : index
    %79 = vector.load %arg15[%c0_47, %c0_48] : memref<32x16xf32, #tpu.memory_space<vmem>>, vector<32x16xf32>
    %cst_49 = arith.constant dense<0.000000e+00> : vector<8x16xf32>
    %80 = tpu.matmul %78, %79, %cst_49 {dimension_numbers = #tpu.dot_dimension_numbers<[1], [0], [0], [1], [0, 0, 1, 1], [], []>} : vector<8x32xf32>, vector<32x16xf32>, vector<8x16xf32> -> vector<8x16xf32>
    %c0_50 = arith.constant 0 : index
    %c0_51 = arith.constant 0 : index
    %81 = vector.load %arg16[%c0_50, %c0_51] : memref<1x16xf32, #tpu.memory_space<vmem>>, vector<1x16xf32>
    %82 = vector.broadcast %81 : vector<1x16xf32> to vector<8x16xf32>
    %83 = arith.addf %80, %82 : vector<8x16xf32>
    %84 = vector.extract_strided_slice %83 {offsets = [0, 0], sizes = [8, 8], strides = [1, 1]} : vector<8x16xf32> to vector<8x8xf32>
    %85 = vector.extract_strided_slice %83 {offsets = [0, 8], sizes = [8, 8], strides = [1, 1]} : vector<8x16xf32> to vector<8x8xf32>
    %cst_52 = arith.constant -2.000000e+01 : f32
    %cst_53 = arith.constant 2.000000e+00 : f32
    %86 = vector.broadcast %cst_52 : f32 to vector<8x8xf32>
    %87 = arith.maximumf %86, %85 : vector<8x8xf32>
    %88 = vector.broadcast %cst_53 : f32 to vector<8x8xf32>
    %89 = arith.minimumf %88, %87 : vector<8x8xf32>
    %90 = math.exp %89 : vector<8x8xf32>
    %91 = arith.mulf %90, %5 : vector<8x8xf32>
    %92 = arith.addf %84, %91 : vector<8x8xf32>
    %93 = math.tanh %92 : vector<8x8xf32>
    %94 = arith.mulf %5, %5 : vector<8x8xf32>
    %cst_54 = arith.constant -5.000000e-01 : f32
    %95 = vector.broadcast %cst_54 : f32 to vector<8x8xf32>
    %96 = arith.mulf %95, %94 : vector<8x8xf32>
    %97 = arith.subf %96, %89 : vector<8x8xf32>
    %cst_55 = arith.constant 0.918938517 : f32
    %98 = vector.broadcast %cst_55 : f32 to vector<8x8xf32>
    %99 = arith.subf %97, %98 : vector<8x8xf32>
    %100 = arith.mulf %93, %93 : vector<8x8xf32>
    %cst_56 = arith.constant 1.000000e+00 : f32
    %101 = vector.broadcast %cst_56 : f32 to vector<8x8xf32>
    %102 = arith.subf %101, %100 : vector<8x8xf32>
    %cst_57 = arith.constant 9.99999997E-7 : f32
    %103 = vector.broadcast %cst_57 : f32 to vector<8x8xf32>
    %104 = arith.addf %102, %103 : vector<8x8xf32>
    %105 = math.log %104 : vector<8x8xf32>
    %106 = arith.subf %99, %105 : vector<8x8xf32>
    %cst_58 = arith.constant dense<0.000000e+00> : vector<8xf32>
    %107 = vector.multi_reduction <add>, %106, %cst_58 [1] : vector<8x8xf32> to vector<8xf32>
    %108 = vector.shape_cast %107 : vector<8xf32> to vector<8x1xf32>
    %c0_59 = arith.constant 0 : index
    %c0_60 = arith.constant 0 : index
    %c0_61 = arith.constant 0 : index
    %109 = vector.load %arg17[%c0_59, %c0_60, %c0_61] : memref<1x8x128xf32, #tpu.memory_space<vmem>>, vector<1x8x8xf32>
    %110 = vector.shape_cast %109 : vector<1x8x8xf32> to vector<8x8xf32>
    %111 = vector.shape_cast %93 : vector<8x8xf32> to vector<1x8x8xf32>
    tpu.vector_store %arg17[%c0_59, %c0_60, %c0_61], %111 {strides = array<i32>} : memref<1x8x128xf32, #tpu.memory_space<vmem>>, vector<1x8x8xf32>,
    %c0_62 = arith.constant 0 : index
    %c0_63 = arith.constant 0 : index
    %c8 = arith.constant 8 : index
    %112 = vector.load %arg17[%c0_62, %c0_63, %c8] : memref<1x8x128xf32, #tpu.memory_space<vmem>>, vector<1x8x8xf32>
    %113 = vector.shape_cast %112 : vector<1x8x8xf32> to vector<8x8xf32>
    %114 = vector.shape_cast %84 : vector<8x8xf32> to vector<1x8x8xf32>
    tpu.vector_store %arg17[%c0_62, %c0_63, %c8], %114 {strides = array<i32>} : memref<1x8x128xf32, #tpu.memory_space<vmem>>, vector<1x8x8xf32>,
    %c0_64 = arith.constant 0 : index
    %c0_65 = arith.constant 0 : index
    %c16 = arith.constant 16 : index
    %115 = vector.load %arg17[%c0_64, %c0_65, %c16] : memref<1x8x128xf32, #tpu.memory_space<vmem>>, vector<1x8x8xf32>
    %116 = vector.shape_cast %115 : vector<1x8x8xf32> to vector<8x8xf32>
    %117 = vector.shape_cast %89 : vector<8x8xf32> to vector<1x8x8xf32>
    tpu.vector_store %arg17[%c0_64, %c0_65, %c16], %117 {strides = array<i32>} : memref<1x8x128xf32, #tpu.memory_space<vmem>>, vector<1x8x8xf32>,
    %c0_66 = arith.constant 0 : index
    %c0_67 = arith.constant 0 : index
    %c24 = arith.constant 24 : index
    %118 = vector.load %arg17[%c0_66, %c0_67, %c24] : memref<1x8x128xf32, #tpu.memory_space<vmem>>, vector<1x8x8xf32>
    %119 = vector.shape_cast %118 : vector<1x8x8xf32> to vector<8x8xf32>
    %120 = vector.shape_cast %90 : vector<8x8xf32> to vector<1x8x8xf32>
    tpu.vector_store %arg17[%c0_66, %c0_67, %c24], %120 {strides = array<i32>} : memref<1x8x128xf32, #tpu.memory_space<vmem>>, vector<1x8x8xf32>,
    %c0_68 = arith.constant 0 : index
    %c0_69 = arith.constant 0 : index
    %c32 = arith.constant 32 : index
    %121 = vector.load %arg17[%c0_68, %c0_69, %c32] : memref<1x8x128xf32, #tpu.memory_space<vmem>>, vector<1x8x8xf32>
    %122 = vector.shape_cast %121 : vector<1x8x8xf32> to vector<8x8xf32>
    %123 = vector.shape_cast %92 : vector<8x8xf32> to vector<1x8x8xf32>
    tpu.vector_store %arg17[%c0_68, %c0_69, %c32], %123 {strides = array<i32>} : memref<1x8x128xf32, #tpu.memory_space<vmem>>, vector<1x8x8xf32>,
    %c0_70 = arith.constant 0 : index
    %c0_71 = arith.constant 0 : index
    %c40 = arith.constant 40 : index
    %124 = vector.load %arg17[%c0_70, %c0_71, %c40] : memref<1x8x128xf32, #tpu.memory_space<vmem>>, vector<1x8x16xf32>
    %125 = vector.shape_cast %124 : vector<1x8x16xf32> to vector<8x16xf32>
    %126 = vector.shape_cast %48 : vector<8x16xf32> to vector<1x8x16xf32>
    tpu.vector_store %arg17[%c0_70, %c0_71, %c40], %126 {strides = array<i32>} : memref<1x8x128xf32, #tpu.memory_space<vmem>>, vector<1x8x16xf32>,
    %c0_72 = arith.constant 0 : index
    %c0_73 = arith.constant 0 : index
    %c56 = arith.constant 56 : index
    %127 = vector.load %arg17[%c0_72, %c0_73, %c56] : memref<1x8x128xf32, #tpu.memory_space<vmem>>, vector<1x8x16xf32>
    %128 = vector.shape_cast %127 : vector<1x8x16xf32> to vector<8x16xf32>
    %129 = vector.shape_cast %35 : vector<8x16xf32> to vector<1x8x16xf32>
    tpu.vector_store %arg17[%c0_72, %c0_73, %c56], %129 {strides = array<i32>} : memref<1x8x128xf32, #tpu.memory_space<vmem>>, vector<1x8x16xf32>,
    %c0_74 = arith.constant 0 : index
    %c0_75 = arith.constant 0 : index
    %c72 = arith.constant 72 : index
    %130 = vector.load %arg17[%c0_74, %c0_75, %c72] : memref<1x8x128xf32, #tpu.memory_space<vmem>>, vector<1x8x1xf32>
    %131 = vector.shape_cast %130 : vector<1x8x1xf32> to vector<8x1xf32>
    %132 = vector.shape_cast %108 : vector<8x1xf32> to vector<1x8x1xf32>
    tpu.vector_store %arg17[%c0_74, %c0_75, %c72], %132 {strides = array<i32>} : memref<1x8x128xf32, #tpu.memory_space<vmem>>, vector<1x8x1xf32>,
    %c0_76 = arith.constant 0 : index
    %c0_77 = arith.constant 0 : index
    %c73 = arith.constant 73 : index
    %133 = vector.load %arg17[%c0_76, %c0_77, %c73] : memref<1x8x128xf32, #tpu.memory_space<vmem>>, vector<1x8x1xf32>
    %134 = vector.shape_cast %133 : vector<1x8x1xf32> to vector<8x1xf32>
    %135 = vector.shape_cast %61 : vector<8x1xf32> to vector<1x8x1xf32>
    tpu.vector_store %arg17[%c0_76, %c0_77, %c73], %135 {strides = array<i32>} : memref<1x8x128xf32, #tpu.memory_space<vmem>>, vector<1x8x1xf32>,
    %cst_78 = arith.constant 0.000000e+00 : f32
    %136 = vector.broadcast %cst_78 : f32 to vector<8x54xf32>
    %c0_79 = arith.constant 0 : index
    %c0_80 = arith.constant 0 : index
    %c74 = arith.constant 74 : index
    %137 = vector.load %arg17[%c0_79, %c0_80, %c74] : memref<1x8x128xf32, #tpu.memory_space<vmem>>, vector<1x8x54xf32>
    %138 = vector.shape_cast %137 : vector<1x8x54xf32> to vector<8x54xf32>
    %139 = vector.shape_cast %136 : vector<8x54xf32> to vector<1x8x54xf32>
    tpu.vector_store %arg17[%c0_79, %c0_80, %c74], %139 {strides = array<i32>} : memref<1x8x128xf32, #tpu.memory_space<vmem>>, vector<1x8x54xf32>,
    return
  }
  func.func @transform_0(%arg0: i32) -> (i32, i32, i32) {
    %c0_i32 = arith.constant 0 : i32
    %c0_i32_0 = arith.constant 0 : i32
    %c0_i32_1 = arith.constant 0 : i32
    return %arg0, %c0_i32, %c0_i32_0 : i32, i32, i32
  }
  func.func @transform_1(%arg0: i32) -> (i32, i32, i32) {
    %c0_i32 = arith.constant 0 : i32
    %c0_i32_0 = arith.constant 0 : i32
    %c0_i32_1 = arith.constant 0 : i32
    return %arg0, %c0_i32, %c0_i32_0 : i32, i32, i32
  }
  func.func @transform_2(%arg0: i32) -> (i32, i32, i32) {
    %c0_i32 = arith.constant 0 : i32
    %c0_i32_0 = arith.constant 0 : i32
    %c0_i32_1 = arith.constant 0 : i32
    return %arg0, %c0_i32, %c0_i32_0 : i32, i32, i32
  }
  func.func @transform_3(%arg0: i32) -> (i32, i32) {
    %c0_i32 = arith.constant 0 : i32
    %c0_i32_0 = arith.constant 0 : i32
    %c0_i32_1 = arith.constant 0 : i32
    return %c0_i32, %c0_i32_0 : i32, i32
  }
  func.func @transform_4(%arg0: i32) -> (i32, i32) {
    %c0_i32 = arith.constant 0 : i32
    %c0_i32_0 = arith.constant 0 : i32
    %c0_i32_1 = arith.constant 0 : i32
    return %c0_i32, %c0_i32_0 : i32, i32
  }
  func.func @transform_5(%arg0: i32) -> (i32, i32) {
    %c0_i32 = arith.constant 0 : i32
    %c0_i32_0 = arith.constant 0 : i32
    %c0_i32_1 = arith.constant 0 : i32
    return %c0_i32, %c0_i32_0 : i32, i32
  }
  func.func @transform_6(%arg0: i32) -> (i32, i32) {
    %c0_i32 = arith.constant 0 : i32
    %c0_i32_0 = arith.constant 0 : i32
    %c0_i32_1 = arith.constant 0 : i32
    return %c0_i32, %c0_i32_0 : i32, i32
  }
  func.func @transform_7(%arg0: i32) -> (i32, i32) {
    %c0_i32 = arith.constant 0 : i32
    %c0_i32_0 = arith.constant 0 : i32
    %c0_i32_1 = arith.constant 0 : i32
    return %c0_i32, %c0_i32_0 : i32, i32
  }
  func.func @transform_8(%arg0: i32) -> (i32, i32) {
    %c0_i32 = arith.constant 0 : i32
    %c0_i32_0 = arith.constant 0 : i32
    %c0_i32_1 = arith.constant 0 : i32
    return %c0_i32, %c0_i32_0 : i32, i32
  }
  func.func @transform_9(%arg0: i32) -> (i32, i32) {
    %c0_i32 = arith.constant 0 : i32
    %c0_i32_0 = arith.constant 0 : i32
    %c0_i32_1 = arith.constant 0 : i32
    return %c0_i32, %c0_i32_0 : i32, i32
  }
  func.func @transform_10(%arg0: i32) -> (i32, i32) {
    %c0_i32 = arith.constant 0 : i32
    %c0_i32_0 = arith.constant 0 : i32
    %c0_i32_1 = arith.constant 0 : i32
    return %c0_i32, %c0_i32_0 : i32, i32
  }
  func.func @transform_11(%arg0: i32) -> (i32, i32) {
    %c0_i32 = arith.constant 0 : i32
    %c0_i32_0 = arith.constant 0 : i32
    %c0_i32_1 = arith.constant 0 : i32
    return %c0_i32, %c0_i32_0 : i32, i32
  }
  func.func @transform_12(%arg0: i32) -> (i32, i32) {
    %c0_i32 = arith.constant 0 : i32
    %c0_i32_0 = arith.constant 0 : i32
    %c0_i32_1 = arith.constant 0 : i32
    return %c0_i32, %c0_i32_0 : i32, i32
  }
  func.func @transform_13(%arg0: i32) -> (i32, i32) {
    %c0_i32 = arith.constant 0 : i32
    %c0_i32_0 = arith.constant 0 : i32
    %c0_i32_1 = arith.constant 0 : i32
    return %c0_i32, %c0_i32_0 : i32, i32
  }
  func.func @transform_14(%arg0: i32) -> (i32, i32) {
    %c0_i32 = arith.constant 0 : i32
    %c0_i32_0 = arith.constant 0 : i32
    %c0_i32_1 = arith.constant 0 : i32
    return %c0_i32, %c0_i32_0 : i32, i32
  }
  func.func @transform_15(%arg0: i32) -> (i32, i32) {
    %c0_i32 = arith.constant 0 : i32
    %c0_i32_0 = arith.constant 0 : i32
    %c0_i32_1 = arith.constant 0 : i32
    return %c0_i32, %c0_i32_0 : i32, i32
  }
  func.func @transform_16(%arg0: i32) -> (i32, i32, i32) {
    %c0_i32 = arith.constant 0 : i32
    %c0_i32_0 = arith.constant 0 : i32
    %c0_i32_1 = arith.constant 0 : i32
    return %arg0, %c0_i32, %c0_i32_0 : i32, i32, i32
  }
}

</mosaic_0001>

<bundles_post_ra>
// kernel: tpu_custom_call.1
= control target key start
LH: loop header
LB: loop body
LE: loop exit
PB: predicated region body
PF: predicated region fallthrough
CT: control target
= control target key end

     0   :  { %s1907_s0 = inlined_call_operand.vmem [shape: f32[4,8,16], index: 0, kind: input, shape index: {}]   ;;  %s1908_s1 = inlined_call_operand.vmem [shape: f32[4,8,25], index: 1, kind: input, shape index: {}]   ;;  %s1909_s2 = inlined_call_operand.hbm [shape: f32[4,8,8], index: 2, kind: input, shape index: {}]   ;;  %s1910_s3 = inlined_call_operand.hbm [shape: f32[25,32], index: 3, kind: input, shape index: {}]   ;;  %s1911_s4 = inlined_call_operand.vmem [shape: f32[1,32], index: 4, kind: input, shape index: {}]   ;;  %s1912_s5 = inlined_call_operand.hbm [shape: f32[32,32], index: 5, kind: input, shape index: {}]   ;;  %s1913_s6 = inlined_call_operand.vmem [shape: f32[1,32], index: 6, kind: input, shape index: {}]   ;;  %s1914_s7 = inlined_call_operand.vmem [shape: f32[32,16], index: 7, kind: input, shape index: {}]   ;;  %s1915_s8 = inlined_call_operand.vmem [shape: f32[1,16], index: 8, kind: input, shape index: {}]   ;;  %s1916_s9 = inlined_call_operand.vmem [shape: f32[16,32], index: 9, kind: input, shape index: {}]   ;;  %s1917_s10 = inlined_call_operand.hbm [shape: f32[16,32], index: 10, kind: input, shape index: {}]   ;;  %s1918_s11 = inlined_call_operand.vmem [shape: f32[1,32], index: 11, kind: input, shape index: {}]   ;;  %s1919_s12 = inlined_call_operand.hbm [shape: f32[32,32], index: 12, kind: input, shape index: {}]   ;;  %s1920_s13 = inlined_call_operand.vmem [shape: f32[1,32], index: 13, kind: input, shape index: {}]   ;;  %s1921_s14 = inlined_call_operand.vmem [shape: f32[32,16], index: 14, kind: input, shape index: {}]   ;;  %s1922_s15 = inlined_call_operand.vmem [shape: f32[1,16], index: 15, kind: input, shape index: {}]   ;;  %s1923_s16 = inlined_call_operand.hbm [shape: f32[4,8,128], index: 16, kind: output, shape index: {}]  }
   0x1   :  { %1929 = sst [smem:[#allocation20_spill]] %s1907_s0 }
   0x2   :  { %1930 = sst [smem:[#allocation21_spill]] %s1910_s3 }
   0x3   :  { %1931 = sst [smem:[#allocation22_spill]] %s1912_s5 }
   0x4   :  { %1932 = sst [smem:[#allocation23_spill]] %s1917_s10 }
   0x5   :  { %1933 = sst [smem:[#allocation24_spill]] %s1919_s12 }
   0x6   :  { %1934 = sst [smem:[#allocation25_spill]] %s1922_s15 }
   0x7   :  { %1935 = sst [smem:[#allocation26_spill]] %s1923_s16 }
   0x8   :  { %21 = vsyncpa [#allocation3], 0 }
   0x9   :  { %23 = vsyncpa [#allocation3 + $0x1], 0 }
   0xa   :  { %24 = vsyncpa [#allocation6], 0 }
   0xb   :  { %25 = vsyncpa [#allocation9], 0 }
   0xc   :  { %26 = vsyncpa [#allocation4], 0 }
   0xd   :  { %28 = vsyncpa [#allocation4 + $0x1], 0  ;;  %s1639_s21 = smov 0   ;;  %s1641_s22 = smov 0  }
   0xe   :  { %s1643_s23 = smov 0   ;;  %s1645_s24 = smov 0  }
   0xf LB: > { %1936 = sst [smem:[#allocation16_spill]] %s1534_s23  ;;  %s1663_s28 = sadd.s32 4294967295, %s1538_s24   ;;  %s1538_s24 = sphi %s1645_s24, %s1955_s24   ;;  %s1534_s23 = sphi %s1643_s23, %s1957_s23   ;;  %s1530_s22 = sphi %s1641_s22, %s1959_s22   ;;  %s1526_s21 = sphi %s1639_s21, %s1958_s21  }
  0x10   : > { %s1937_s3 = sld [smem:[#allocation21_spill]]  ;;  %p1163_p0 = scmp.ge.s32.totalorder %s1538_s24, 1 }
  0x11   : > { %p107_p1 = scmp.eq.s32.totalorder %s1663_s28, 0  ;;  %p416_p2 = scmp.lt.s32.totalorder %s1538_s24, 5 }
  0x12   : > { %s1540_s30 = smov [#allocation5]   ;;  %s1939_s10 = sld [smem:[#allocation23_spill]] }
  0x13   : > { %p1668_p3 = pnand %p1163_p0, %p416_p2  ;;  %s429_s0 = sshll.u32 %s1540_s30, 4  ;;  %s430_s0 = int_to_ptr.vmem [resolvable:$true] %s429_s0 }
  0x14   : > { %s1941_s5 = sld [smem:[#allocation22_spill]]  ;;  %s1542_s15 = smov 128  }
  0x15   : > { %p1215_p4 = pneg %p1668_p3  ;;  %s1543_s17 = smov 8  }
  0x16   : > { %s427_s27 = sshll.u32 %s1937_s3, 4  ;;  %s1541_s3 = smov [#allocation8]   ;;  %s428_s27 = int_to_ptr.hbm [resolvable:$true] %s427_s27 }
  0x17   : > { %p1679_p5 = pnand %p1215_p4, %p107_p1  ;;  %s472_s16 = sshll.u32 %s1541_s3, 4  ;;  %s473_s16 = int_to_ptr.vmem [resolvable:$true] %s472_s16 }
  0x18   : > { %s470_s19 = sshll.u32 %s1939_s10, 4  ;;  %s1942_s12 = sld [smem:[#allocation24_spill]]  ;;  %s471_s19 = int_to_ptr.hbm [resolvable:$true] %s470_s19 }
  0x19   : > { %1218 = dma.hbm_to_vmem [thread:$0]  (!%p1679_p5), %s428_s27, 512, %s430_s0, [#allocation6], %s1542_s15, %s1542_s15, %s1543_s17  }
  0x1a   : > { %s444_s30 = sshll.u32 %s1941_s5, 4  ;;  %s1544_s3 = smov [#allocation7]   ;;  %s445_s30 = int_to_ptr.hbm [resolvable:$true] %s444_s30 }
  0x1b   : > { %1224 = dma.hbm_to_vmem [thread:$0]  (!%p1679_p5), %s471_s19, 256, %s473_s16, [#allocation9], %s1542_s15, %s1542_s15, %s1543_s17  }
  0x1c   : > { %s446_s26 = sshll.u32 %s1544_s3, 4  ;;  %s1545_s27 = smov [#allocation10]   ;;  %s447_s26 = int_to_ptr.vmem [resolvable:$true] %s446_s26 }
  0x1d   : > { %1221 = dma.hbm_to_vmem [thread:$0]  (!%p1679_p5), %s445_s30, 512, %s447_s26, [#allocation6], %s1542_s15, %s1542_s15, %s1543_s17  }
  0x1e   : > { %s487_s25 = sshll.u32 %s1942_s12, 4  ;;  %s489_s16 = sshll.u32 %s1545_s27, 4  ;;  %s488_s25 = int_to_ptr.hbm [resolvable:$true] %s487_s25  ;;  %s490_s16 = int_to_ptr.vmem [resolvable:$true] %s489_s16 }
  0x1f   : > { %1227 = dma.hbm_to_vmem [thread:$0]  (!%p1679_p5), %s488_s25, 512, %s490_s16, [#allocation9], %s1542_s15, %s1542_s15, %s1543_s17  }
  0x20   : > { %s1162_s10 = sadd.s32 4294967294, %s1538_s24   ;;  %s1699_s0 = sadd.s32 1, %s1538_s24  }
  0x21   : > { %1943 = sst [smem:[#allocation17_spill]] %s1699_s0  ;;  %s90_s19 = ssub.s32 %s1538_s24, %s1699_s0 }
  0x22   : > { %s93_s18 = sadd.s32 1, %s1534_s23  ;;  %p91_p6 = scmp.eq.s32.totalorder %s90_s19, 0 }
  0x23   : > { %p100_p7 = scmp.ne.s32.totalorder %s1534_s23, %s1530_s22  ;;  %p101_p8 = scmp.eq.s32.totalorder %s1538_s24, 0 }
  0x24   : > { %p106_p9 = scmp.ne.s32.totalorder %s1530_s22, %s1526_s21  ;;  %p403_p12 = scmp.eq.s32.totalorder %s1663_s28, 3 }
  0x25   : > { %s1710_s30 = scalar_select %p91_p6, %s1534_s23, %s93_s18  }
  0x26   : > { %p1712_p10 = por %p101_p8, %p100_p7  ;;  %p1718_p11 = por %p107_p1, %p106_p9 }
  0x27   : > { %1944 = sst [smem:[#allocation18_spill]] %s1710_s30  ;;  %p409_p13 = scmp.eq.s32.totalorder %s1162_s10, 3 }
  0x28   : > { %p1240_p0 = scmp.lt.s32.totalorder %s1538_s24, 4  ;;  %s526_s20 = sand.u32 1, %s1534_s23  }
  0x29   : > { %p1725_p2 = por %p403_p12, %p100_p7  ;;  %p1729_p4 = por %p409_p13, %p106_p9 }
  0x2a   : > { %s1169_s26 = sshll.u32 %s526_s20, 3  ;;  %s1170_s27 = sshll.u32 %s1538_s24, 3 }
  0x2b   : > { %s1948_s25 = scalar_select %p1729_p4, 1, 0 }
  0x2c   : > { %s534_s18 = scalar_lea.hbm %s1909_s2, %s1170_s27  ;;  %s530_s5 = scalar_lea.vmem [#allocation2], %s1169_s26 }
  0x2d   : > { %1949 = sst [smem:[#allocation19_spill]] %s1948_s25  ;;  %s538_s12 = sshll.u32 %s530_s5, 4  ;;  %s539_s12 = int_to_ptr.vmem [resolvable:$true] %s538_s12 }
  0x2e   : > { %s536_s30 = sshll.u32 %s534_s18, 4  ;;  %p1739_p5 = pnand %p1240_p0, %p1712_p10  ;;  %s537_s30 = int_to_ptr.hbm [resolvable:$true] %s536_s30 }
  0x2f   : > { %s527_s23 = scalar_lea.sflag [#allocation3], %s526_s20  ;;  %s1434_s0 = sshra.s32 %s537_s30, 4  ;;  %s1435_s0 = int_to_ptr.hbm [resolvable:$true] %s1434_s0 }
  0x30   : > { %s1436_s25 = scalar_lea.hbm %s1435_s0, 8  ;;  %p1438_p7 = pneg %p1739_p5 }
  0x31   : > { %p1437_p6 = scmp.ne.s32.totalorder %s1435_s0, %s1436_s25  ;;  %s1441_s27 = scalar_lea.hbm %s1909_s2, 32 }
  0x32   : > { %p1442_p10 = scmp.lt.s32.totalorder %s1435_s0, %s1909_s2  ;;  %p1443_p12 = scmp.lt.s32.totalorder %s1441_s27, %s1436_s25 }
  0x33   : > { %p1439_p8 = pnand %p1438_p7, %p1437_p6 }
  0x34   : > { %p1444_p13 = por %p1443_p12, %p1442_p10 }
  0x35   : > { %p1440_p9 = pneg %p1439_p8 }
  0x37   : > { %p1445_p0 = pnand %p1444_p13, %p1440_p9 }
  0x39   : > { %1448 = shalt.err (!%p1445_p0)
}
  0x3a   : > { %1231 = dma.hbm_to_vmem [thread:$0]  (!%p1739_p5), %s537_s30, 128, %s539_s12, %s527_s23  }
  0x3b   : > { %547 = sbr.rel (%p1668_p3) target bundleno = 1338 (0x53a), region = 84  ;;  %s1756_s20 = sand.u32 (!%p1668_p3), 1, %s1530_s22  }
  0x3c   : > { %s1172_s19 = sshll.u32 (!%p1668_p3), %s1756_s20, 3  ;;  %s550_s18 = scalar_lea.sflag (!%p1668_p3), [#allocation3], %s1756_s20 }
  0x3d   : > { %s1762_s0 = scalar_lea.vmem (!%p1668_p3), [#allocation2], %s1172_s19 }
  0x40   : > { %1509 = dma.done.wait (%p1718_p11), %s550_s18, 128  }
  0x41   : > { %1511 = vsyncadd (%p1718_p11), %s550_s18, 4294967168 }
  0x42   : > { %1513 = dma.done.wait (%p107_p1), [#allocation6], 1024  }
  0x43   : > { %1515 = vsyncadd (%p107_p1), [#allocation6], 4294966272 }
  0x44   : > { %1517 = dma.done.wait (%p107_p1), [#allocation9], 768  }
  0x45   : > { %1519 = vsyncadd (%p107_p1), [#allocation9], 4294966528  ;;  %p631_p3 = scmp.lt.s32.totalorder %s1663_s28, 3  ;;  %vm654_vm0 = vcmask 1040384   ;;  %v645_v0 = vld [vmem:[#allocation5 + $0x18] sm:$0x1]  ;;  %v743_v26 = vlaneseq }
  0x46   : > { %v644_v1 = vld [vmem:[#allocation5 + $0x10] sm:$0xff]  ;;  %1180 = vmatpush.msk.msra.mxu0 %vm654_vm0, %v645_v0  ;;  %v682_v2 = vld [vmem:[#allocation7 + $0x18] sm:$0xff]  ;;  %v643_v3 = vld [vmem:[#allocation5 + $0x8] sm:$0xff]  ;;  %vm650_vm1 = vcmask 203776   ;;  %vm687_vm2 = vcmask 261120   ;;  %v1546_v40 = vmov 0.0  }
  0x47   : > { %s1778_s12 = scalar_select %p631_p3, %s1663_s28, 3  ;;  %703 = vmatpush.msra.mxu1 %v682_v2  ;;  %v642_v4 = vld [vmem:[#allocation5] sm:$0xff]  ;;  %v681_v6 = vld [vmem:[#allocation7 + $0x10] sm:$0xff]  ;;  %v680_v7 = vld [vmem:[#allocation7 + $0x8] sm:$0xff]  ;;  %v744_v29 = vand.u32 127, %v743_v26  ;;  %v762_v32 = vshrl.u32 %v743_v26, 7 }
  0x48   : > { %671 = vmatpush.msra.mxu0 %v644_v1  ;;  %v679_v8 = vld [vmem:[#allocation7] sm:$0xff]  ;;  %v715_v9 = vld [vmem:[%s1914_s7 + $0x18] sm:$0xff]  ;;  %v1292_v10 = vld [vmem:[%s1911_s4] ss:$0 sm:$0xff]  ;;  %vm767_vm7 = vcmask 64512   ;;  %s1547_s5 = smov 120  }
  0x49   : > { %s1178_s23 = sshll.u32 %s1778_s12, 3  ;;  %704 = vmatpush.msra.mxu1 %v681_v6  ;;  %735 = vmatpush.msra.mxu2 %v715_v9  ;;  %v714_v14 = vld [vmem:[%s1914_s7 + $0x10] sm:$0xff]  ;;  %v713_v15 = vld [vmem:[%s1914_s7 + $0x8] sm:$0xff]  ;;  %v712_v16 = vld [vmem:[%s1914_s7] sm:$0xff]  ;;  %v763_v33 = vadd.s32 1, %v744_v29  ;;  %vm745_vm4 = vcmp.ge.s32.totalorder %v744_v29, 8 }
  0x4a   : > { %s638_s15 = scalar_lea.vmem %s1908_s1, %s1178_s23  ;;  %672 = vmatpush.msra.mxu0 %v643_v3  ;;  %v1293_v17 = vld [vmem:[%s1913_s6] ss:$0 sm:$0xff]  ;;  %v824_v45 = vld [vmem:[#allocation8 + $0x8] sm:$0xff]  ;;  %v823_v46 = vld [vmem:[#allocation8] sm:$0xff]  ;;  %s1951_s3 = sld [smem:[#allocation20_spill]]  ;;  %vm825_vm8 = vcmask 130048  }
  0x4b   : > { %v640_v5 = vld [vmem:[%s638_s15] sm:$0xff]  ;;  %705 = vmatpush.msra.mxu1 %v680_v7  ;;  %736 = vmatpush.msra.mxu2 %v714_v14  ;;  %vm764_vm3 = vcmp.eq.s32.totalorder %v762_v32, %v763_v33  ;;  %v822_v47 = vld [vmem:[%s1916_s9 + $0x8] sm:$0xff]  ;;  %vm791_vm9 = vcmp.eq.s32.totalorder %v762_v32, 0  ;;  %v881_v54 = vld [vmem:[#allocation10 + $0x18] sm:$0xff]  ;;  %s1548_s15 = smov 8   ;;  %s1952_s26 = sld [smem:[#allocation25_spill]] }
  0x4c   : > { %673 = vmatpush.msra.mxu0 %v642_v4  ;;  %v1294_v21 = vld [vmem:[%s1915_s8] ss:$0 sm:$0xff]  ;;  %v1184_v41 = vsel %vm764_vm3, 1.0, %v1546_v40  ;;  %v880_v55 = vld [vmem:[#allocation10 + $0x10] sm:$0xff]  ;;  %v879_v56 = vld [vmem:[#allocation10 + $0x8] sm:$0xff]  ;;  %s1550_s27 = smov 32  }
  0x4d   : > { %1181 = vmatmul.msk.f32.vlgmr.msra.gmra.mxu0 %vm650_vm1, %v640_v5  ;;  %706 = vmatpush.msra.mxu1 %v679_v8  ;;  %v821_v48 = vld [vmem:[%s1916_s9] sm:$0xff]  ;;  %v913_v2 = vld [vmem:[%s1921_s14 + $0x18] sm:$0xff]  ;;  %v912_v3 = vld [vmem:[%s1921_s14 + $0x10] sm:$0xff]  ;;  %vm978_vm10 = vcmask 130112   ;;  %s1551_s16 = smov 56   ;;  %vm983_vm11 = vcmask 195712  }
  0x4e   : > { %737 = vmatpush.msra.mxu2 %v713_v15  ;;  %866 = vmatpush.msrb.mxu0 %v822_v47  ;;  %v878_v57 = vld [vmem:[#allocation10] sm:$0xff]  ;;  %v911_v4 = vld [vmem:[%s1921_s14 + $0x8] sm:$0xff]  ;;  %vm989_vm13 = vcmask 261312   ;;  %vm995_vm14 = vcmask 326912   ;;  %s1953_s30 = sld [smem:[#allocation26_spill]]  ;;  %vm1000_vm15 = vcmask 458048  }
  0x4f   : > { %901 = vmatpush.msrb.mxu1 %v881_v54  ;;  %v1295_v61 = vld [vmem:[%s1918_s11] ss:$0 sm:$0xff]  ;;  %vm1006_vm0 = vcmask 589248   ;;  %vm1008_vm1 = vcmask 597568   ;;  %vm1012_vm3 = vcmask 1048144   ;;  %s1015_s12 = scalar_lea.sflag [#allocation4], %s1756_s20 }
  0x50   : > { %738 = vmatpush.msra.mxu2 %v712_v16  ;;  %s634_s18 = scalar_lea.vmem %s1951_s3, %s1178_s23  ;;  %867 = vmatpush.msrb.mxu0 %v821_v48  ;;  %v910_v5 = vld [vmem:[%s1921_s14] sm:$0xff]  ;;  %s1192_s3 = sshll.u32 %s1663_s28, 3 }
  0x51   : > { %v639_v49 = vld [vmem:[%s634_s18] sm:$0xff]  ;;  %902 = vmatpush.msrb.mxu1 %v880_v55 }
  0x52   : > { %933 = vmatpush.msrb.mxu2 %v913_v2  ;;  %v641_v6 = vld [vmem:[%s1762_s0] sm:$0xff]  ;;  %s1549_s0 = smov 40  }
  0x53   : > { %903 = vmatpush.msrb.mxu1 %v879_v56  ;;  %946 = vrot.lane.b32.xlu0 %v641_v6, %s1548_s15  ;;  %v1296_v7 = vld [vmem:[%s1920_s13] ss:$0 sm:$0xff] }
  0x54   : > { %934 = vmatpush.msrb.mxu2 %v912_v3 }
  0x55   : > { %1187 = vmatmul.msk.f32.vlgmr.msrb.gmra.mxu0 %vm825_vm8, %v639_v49  ;;  %904 = vmatpush.msrb.mxu1 %v878_v57 }
  0x56   : > { %935 = vmatpush.msrb.mxu2 %v911_v4 }
  0x58   : > { %936 = vmatpush.msrb.mxu2 %v910_v5 }
  0xca   : > { %v675_v11 = vpop.f32.mrf.mxu0 }
  0xcb   : > { %v676_v12 = vadd.f32 %v1292_v10, %v675_v11  ;;  %v1297_v11 = vld [vmem:[%s1952_s26] ss:$0 sm:$0xff] }
  0xcd   : > { %v678_v13 = vmax.f32 %v676_v12, 0.0 }
  0xcf   : > { %1182 = vmatmul.msk.f32.vlgmr.msra.gmra.mxu1 %vm687_vm2, %v678_v13 }
  0xd2   : > { %v869_v60 = vpop.f32.mrf.mxu0 }
 0x14c   : > { %v708_v18 = vpop.f32.mrf.mxu1 }
 0x14d   : > { %v709_v19 = vadd.f32 %v1293_v17, %v708_v18  ;;  %v947_v17 = vpop.permute.xlu0 %946 }
 0x14f   : > { %v711_v20 = vmax.f32 %v709_v19, 0.0 }
 0x151   : > { %1183 = vmatmul.msk.f32.vlgmr.msra.gmra.mxu2 %vm687_vm2, %v711_v20 }
 0x1d4   : > { %v740_v22 = vpop.f32.mrf.mxu2 }
 0x1d5   : > { %v741_v23 = vadd.f32 %v1294_v21, %v740_v22 }
 0x1d7   : > { %v747_v24 = vmin.f32 %v741_v23, 20.0  ;;  %vm746_vm6 = vcmp.gt.f32.partialorder %v741_v23, 20.0 }
 0x1d9   : > { %v748_v25 = vmul.f32 1.442695, %v747_v24 }
 0x1db   : > { %1298 = vpow2.f32 %v748_v25 }
 0x1e1   : > { %v1299_v27 = vpop.eup %1298 }
 0x1e2   : > { %v750_v28 = vadd.f32 1.0, %v1299_v27  ;;  %v753_v30 = vmul.f32 -0.5, %v1299_v27  ;;  %v756_v34 = vand.u32 2147483647, %v1299_v27 }
 0x1e4   : > { %1300 = vlog2.f32 %v750_v28  ;;  %v754_v31 = vadd.f32 1.0, %v753_v30  ;;  %vm757_vm5 = vcmp.lt.f32.partialorder %v756_v34, 0.0004427343  ;;  %v956_v28 = vmul.f32 %v641_v6, %v641_v6 }
 0x1e6   : > { %v755_v37 = vmul.f32 %v1299_v27, %v754_v31  ;;  %v957_v31 = vmul.f32 -0.5, %v956_v28 }
 0x1ea   : > { %v1301_v35 = vpop.eup %1300 }
 0x1eb   : > { %v752_v36 = vmul.f32 0.6931472, %v1301_v35 }
 0x1ed   : > { %v758_v38 = vsel %vm757_vm5, %v755_v37, %v752_v36 }
 0x1ee   : > { %v759_v39 = vsel %vm746_vm6, %v741_v23, %v758_v38 }
 0x1ef   : > { %v1810_v42 = vsel %vm745_vm4, %v759_v39, %v741_v23 }
 0x1f0   : > { %786 = vmatpush.msra.mxu3 %v1810_v42  ;;  %1302 = vlog2.f32 %v1810_v42 }
 0x1f1   : > { %1185 = vmatmul.msk.f32.vlgmr.msra.gmra.mxu3 %vm767_vm7, %v1184_v41 }
 0x1f2   : > { %843 = vmatpush.msrb.mxu3 %v824_v45 }
 0x1f4   : > { %844 = vmatpush.msrb.mxu3 %v823_v46 }
 0x1f6   : > { %v1303_v43 = vpop.eup %1302 }
 0x1f7   : > { %v811_v44 = vmul.f32 0.6931472, %v1303_v43 }
 0x1f9   : > { %813 = vrot.lane.b32.xlu2 %v811_v44, %s1547_s5 }
 0x253   : > { %v814_v20 = vpop.permute.xlu2 %813 }
 0x254   : > { %v816_v21 = vsel %vm767_vm7, %v814_v20, 0.0 }
 0x274   : > { %v788_v50 = vpop.f32.mrf.mxu3 }
 0x275   : > { %v792_v51 = vsel %vm791_vm9, 1.0, %v788_v50 }
 0x276   : > { %1304 = vlog2.f32 %v792_v51  ;;  %1186 = vmatmul.msk.f32.vlgmr.msrb.gmra.mxu3 %vm825_vm8, %v792_v51 }
 0x27c   : > { %v1305_v52 = vpop.eup %1304 }
 0x27d   : > { %v794_v53 = vmul.f32 0.6931472, %v1305_v52 }
 0x27f   : > { %796 = vrot.lane.b32.xlu1 %v794_v53, %s1547_s5 }
 0x2f1   : > { %v797_v58 = vpop.permute.xlu1 %796 }
 0x2f2   : > { %v799_v59 = vsel %vm767_vm7, %v797_v58, 0.0 }
 0x2f3   : > { %800 = vadd.xlane.f32.xlu2 %v799_v59 }
 0x2f9   : > { %v846_v62 = vpop.f32.mrf.mxu3 }
 0x2fa   : > { %v870_v63 = vadd.f32 %v869_v60, %v846_v62 }
 0x2fc   : > { %v876_v0 = vadd.f32 %v1295_v61, %v870_v63 }
 0x2fe   : > { %v877_v1 = vmax.f32 %v876_v0, 0.0 }
 0x300   : > { %1188 = vmatmul.msk.f32.vlgmr.msrb.gmra.mxu1 %vm687_vm2, %v877_v1 }
 0x366   : > { %v801_v24 = vpop.xlane.xlu2 %800 }
 0x37d   : > { %v906_v8 = vpop.f32.mrf.mxu1 }
 0x37e   : > { %v907_v9 = vadd.f32 %v1296_v7, %v906_v8 }
 0x380   : > { %v909_v10 = vmax.f32 %v907_v9, 0.0 }
 0x382   : > { %1189 = vmatmul.msk.f32.vlgmr.msrb.gmra.mxu2 %vm687_vm2, %v909_v10  ;;  %vm1010_vm2 = vcmask 605768  }
 0x405   : > { %v938_v12 = vpop.f32.mrf.mxu2 }
 0x406   : > { %v939_v13 = vadd.f32 %v1297_v11, %v938_v12 }
 0x408   : > { %975 = vrot.lane.b32.xlu2 %v939_v13, %s1548_s15  ;;  %v941_v14 = vmax.f32 %v939_v13, -20.0 }
 0x40a   : > { %v942_v15 = vmin.f32 %v941_v14, 2.0 }
 0x40c   : > { %959 = vrot.lane.b32.xlu1 %v942_v15, %s1547_s5  ;;  %v943_v16 = vmul.f32 1.442695, %v942_v15 }
 0x40e   : > { %1306 = vpow2.f32 %v943_v16 }
 0x414   : > { %v1307_v18 = vpop.eup %1306 }
 0x415   : > { %v949_v19 = vmul.f32 %v1307_v18, %v947_v17 }
 0x417   : > { %951 = vrot.lane.b32.xlu0 %v949_v19, %s1547_s5  ;;  %s1858_s5 = scalar_lea.vmem [#allocation11], %s1172_s19  ;;  %s1552_s19 = smov 16  }
 0x418   : > { %s1027_s28 = sshll.u32 %s1858_s5, 4  ;;  %s1028_s28 = int_to_ptr.vmem [resolvable:$true] %s1027_s28 }
 0x441   : > { %817 = vadd.xlane.f32.xlu0 %v816_v21 }
 0x455   : > { %980 = vrot.lane.b32.xlu0 %v942_v15, %s1548_s15  ;;  %s1025_s15 = scalar_lea.hbm %s1953_s30, %s1192_s3 }
 0x456   : > { %s1029_s25 = sshll.u32 %s1025_s15, 4  ;;  %s1030_s25 = int_to_ptr.hbm [resolvable:$true] %s1029_s25 }
 0x457   : > { %s1478_s23 = sshra.s32 %s1030_s25, 4  ;;  %s1479_s23 = int_to_ptr.hbm [resolvable:$true] %s1478_s23 }
 0x458   : > { %s1480_s10 = scalar_lea.hbm %s1479_s23, 8  ;;  %p1485_p6 = scmp.lt.s32.totalorder %s1479_s23, %s1953_s30 }
 0x459   : > { %p1481_p1 = scmp.ne.s32.totalorder %s1479_s23, %s1480_s10 }
 0x45b   : > { %p1482_p11 = pnand %p1481_p1, %p1725_p2 }
 0x45d   : > { %997 = vrot.lane.b32.xlu0 %v792_v51, %s1549_s0  ;;  %p1483_p5 = pneg %p1482_p11 }
 0x462   : > { %v976_v26 = vpop.permute.xlu2 %975 }
 0x47e   : > { %v960_v32 = vpop.permute.xlu1 %959 }
 0x47f   : > { %v962_v33 = vsub.f32 %v957_v31, %v960_v32 }
 0x481   : > { %v1190_v35 = vadd.f32 -0.9189385, %v962_v33 }
 0x489   : > { %v952_v22 = vpop.permute.xlu0 %951 }
 0x48a   : > { %v954_v23 = vadd.f32 %v952_v22, %v939_v13 }
 0x48c   : > { %1308 = vtanh.f32 %v954_v23  ;;  %992 = vrot.lane.b32.xlu2 %v954_v23, %s1550_s27  ;;  %s1484_s27 = scalar_lea.hbm %s1953_s30, 32 }
 0x48d   : > { %p1486_p7 = scmp.lt.s32.totalorder %s1484_s27, %s1480_s10 }
 0x48f   : > { %p1487_p8 = por %p1486_p7, %p1485_p6 }
 0x491   : > { %p1488_p9 = pnand %p1487_p8, %p1483_p5 }
 0x492   : > { %v1309_v25 = vpop.eup %1308 }
 0x493   : > { %v964_v27 = vmul.f32 %v1309_v25, %v1309_v25  ;;  %973 = vst.msk [vmem:[%s1858_s5] sm:$0xff] %vm767_vm7, %v1309_v25 }
 0x494   : > { %1003 = vrot.lane.b32.xlu2 %v1810_v42, %s1551_s16  ;;  %979 = vst.msk [vmem:[%s1858_s5] sm:$0xff] %vm978_vm10, %v976_v26  ;;  %v1553_v42 = vmov 8.0  }
 0x495   : > { %v965_v29 = vsub.f32 1.0, %v964_v27 }
 0x497   : > { %v966_v30 = vadd.f32 1e-06, %v965_v29 }
 0x499   : > { %1310 = vlog2.f32 %v966_v30 }
 0x49a   : > { %1312 = vrcp.f32 %v1553_v42 }
 0x49f   : > { %v1311_v34 = vpop.eup %1310 }
 0x4a0   : > { %v968_v36 = vmul.f32 0.6931472, %v1311_v34  ;;  %v1313_v43 = vpop.eup %1312 }
 0x4a1   : > { %v803_v44 = vmul.f32 8.0, %v1313_v43  ;;  %vm807_vm12 = vweird.f32 %v1313_v43 }
 0x4a2   : > { %v969_v37 = vsub.f32 %v1190_v35, %v968_v36 }
 0x4a3   : > { %v804_v45 = vsub.f32 1.0, %v803_v44 }
 0x4a4   : > { %v970_v38 = vsel %vm767_vm7, %v969_v37, 0.0 }
 0x4a5   : > { %971 = vadd.xlane.f32.xlu1 %v970_v38  ;;  %v805_v46 = vmul.f32 %v1313_v43, %v804_v45 }
 0x4a7   : > { %v806_v49 = vadd.f32 %v1313_v43, %v805_v46 }
 0x4a9   : > { %v808_v50 = vsel %vm807_vm12, %v1313_v43, %v806_v49 }
 0x4aa   : > { %v809_v53 = vmul.f32 %v808_v50, %v801_v24 }
 0x4b4   : > { %v818_v39 = vpop.xlane.xlu0 %817 }
 0x4b5   : > { %v819_v51 = vmul.f32 %v818_v39, %v808_v50 }
 0x4b7   : > { %v820_v56 = vsub.f32 %v809_v53, %v819_v51 }
 0x4be   : > { %986 = vrot.lane.b32.xlu1 %v1307_v18, %s1552_s19 }
 0x4c7   : > { %v981_v41 = vpop.permute.xlu0 %980 }
 0x4c8   : > { %984 = vst.msk [vmem:[%s1858_s5] sm:$0xff] %vm983_vm11, %v981_v41 }
 0x4cf   : > { %v998_v54 = vpop.permute.xlu0 %997 }
 0x4e6   : > { %v993_v48 = vpop.permute.xlu2 %992 }
 0x4ee   : > { %v1004_v55 = vpop.permute.xlu2 %1003 }
 0x518   : > { %v972_v47 = vpop.xlane.xlu1 %971 }
 0x530   : > { %v987_v52 = vpop.permute.xlu1 %986 }
 0x531   : > { %990 = vst.msk [vmem:[%s1858_s5] sm:$0xff] %vm989_vm13, %v987_v52 }
 0x532   : > { %996 = vst.msk [vmem:[%s1858_s5] sm:$0xff] %vm995_vm14, %v993_v48 }
 0x533   : > { %1001 = vst.msk [vmem:[%s1858_s5] sm:$0xff] %vm1000_vm15, %v998_v54 }
 0x534   : > { %1007 = vst.msk [vmem:[%s1858_s5] sm:$0xff] %vm1006_vm0, %v1004_v55 }
 0x535   : > { %1009 = vst.msk [vmem:[%s1858_s5] sm:$0xff] %vm1008_vm1, %v972_v47 }
 0x536   : > { %1011 = vst.msk [vmem:[%s1858_s5] sm:$0xff] %vm1010_vm2, %v820_v56 }
 0x537   : > { %1013 = vst.msk [vmem:[%s1858_s5] sm:$0xff] %vm1012_vm3, %v1546_v40 }
 0x538   : > { %1491 = shalt.err (!%p1488_p9)
}
 0x539   : > { %1213 = dma.vmem_to_hbm [thread:$0]  (%p1725_p2), %s1028_s28, 128, %s1030_s25, %s1015_s12  }
 0x53a PF: > { %p1245_p10 = scmp.ge.s32.totalorder %s1538_s24, 2  ;;  %s1041_s5 = sand.u32 1, %s1526_s21  }
 0x53b   : > { %s1042_s3 = scalar_lea.sflag [#allocation4], %s1041_s5 }
 0x53c   : > { %p1233_p12 = pnand %p1245_p10, %p1729_p4 }
 0x53e   : > { %p1234_p13 = pneg %p1233_p12 }
 0x540   : > { %1521 = dma.done.wait (%p1234_p13), %s1042_s3, 128  }
 0x541   : > { %1523 = vsyncadd (%p1234_p13), %s1042_s3, 4294967168  ;;  %s1955_s24 = sld [smem:[#allocation17_spill]]  ;;  %s1958_s21 = smov %s1530_s22 }
 0x542   : > { %s1956_s18 = sld [smem:[#allocation16_spill]] }
 0x543   : > { %s1957_s23 = sld [smem:[#allocation18_spill]] }
 0x547   : > { %p31_p0 = scmp.ge.s32.totalorder %s1955_s24, 6  }
 0x548   : > { %s1959_s22 = smov %s1956_s18 }
 0x549   :  { %33 = sbr.rel (!%p31_p0) target bundleno = 15 (0xf), region = 151 }
 0x54e   :  { %1048 = vsyncpa [#allocation3], 1 }
 0x54f   :  { %1050 = vsyncpa [#allocation3 + $0x1], 1 }
 0x550   :  { %1051 = vsyncpa [#allocation6], 1 }
 0x551   :  { %1052 = vsyncpa [#allocation9], 1 }
 0x552   :  { %1053 = vsyncpa [#allocation4], 1 }
 0x553   :  { %1055 = vsyncpa [#allocation4 + $0x1], 1 }

</bundles_post_ra>
